<compile_context>
chip_gen: v7x
topology: tpu7x:2x2x1
jax: 0.10.0
libtpu: 0.0.40
codegen_flags: <defaults>
</compile_context>

<pallas_src>
import functools

import jax
import jax.numpy as jnp
from jax.experimental import pallas as pl
from jax.experimental.pallas import tpu as pltpu


_VMEM_BUDGET = 36 * 1024 * 1024   # per-step working-set target (fits v7x 64 MiB)
_VMEM_LIMIT = 48 * 1024 * 1024    # > 16/32 MiB scoped defaults, < v7x physical


def _round_up(x, m):
    return ((x + m - 1) // m) * m


def _vmem_bytes(bt, ts, s_pad, k, q, h):
    f32 = 4
    kv = 2 * 2 * bt * ts * k * f32            # keys + values, double-buffered
    msk = 2 * bt * ts * 4                     # int32 mask, double-buffered
    qry = 2 * bt * q * f32                    # query block
    wts = 2 * (k * h + q * h + h) * f32       # weights (double-buffered)
    outs = 2 * (bt * k + bt * s_pad) * f32    # context + alphas output blocks
    scr = (bt * s_pad + bt * k + 2 * bt * 128) * f32   # e/acc/m/l scratch (padded)
    tmp = 2 * bt * ts * h * f32               # proj_keys + tanh intermediates
    return kv + msk + qry + wts + outs + scr + tmp


def _select_tiles(b, s, k, q, h):
    """Pick (BT, TS, B_pad, S_pad) so the per-step working set fits VMEM."""
    b_pad = _round_up(b, 8)
    bt_cands = [d for d in range(min(b_pad, 256), 7, -8) if b_pad % d == 0]

    # 1) whole sequence per step; biggest batch tile that fits the budget.
    for bt in bt_cands:
        if _vmem_bytes(bt, s, s, k, q, h) <= _VMEM_BUDGET:
            if bt == b_pad and b_pad >= 16 and (b_pad // 2) % 8 == 0:
                bt = b_pad // 2   # keep >=2 "parallel" grid steps (v7x megacore)
            return bt, s, b_pad, s

    # 2) sequence tiling: TS multiple of 128 (lane-aligned mask / score blocks).
    best = None
    for ts in (2048, 1024, 512, 256, 128):
        if ts >= s:
            continue
        s_pad = _round_up(s, ts)
        for bt in bt_cands:
            if _vmem_bytes(bt, ts, s_pad, k, q, h) <= _VMEM_BUDGET:
                if best is None or bt * ts > best[0] * best[1]:
                    best = (bt, ts, s_pad)
                break
    if best is not None:
        bt, ts, s_pad = best
        return bt, ts, b_pad, s_pad

    # 3) degenerate fallback (enormous K*H): smallest legal tiles.
    ts = s if s <= 128 else 128
    s_pad = s if ts == s else _round_up(s, ts)
    return 8, ts, b_pad, s_pad


def bahdanau_kernel(q_ref, k_ref, v_ref, m_ref, wk_ref, wq_ref, we_ref,
                    ctx_ref, alpha_ref, e_sc, acc_sc, m_sc, l_sc, *, n_s):
    si = pl.program_id(1)
    bt, ts, kdim = k_ref.shape

    @pl.when(si == 0)
    def _init():
        m_sc[...] = jnp.full_like(m_sc, -jnp.inf)
        l_sc[...] = jnp.zeros_like(l_sc)
        acc_sc[...] = jnp.zeros_like(acc_sc)

    keys = k_ref[...]                                   # (BT, TS, K)
    vals = v_ref[...]                                   # (BT, TS, K)
    q = q_ref[...]                                      # (BT, Q)
    msk = m_ref[...]                                    # (BT, TS) int32, !=0 == valid

    wk = wk_ref[...]                                    # (K, H)
    wq = wq_ref[...]                                    # (Q, H)
    we = we_ref[...]                                    # (1, H)

    # --- projections (MXU, f32 accumulation) --------------------------------
    pk = jnp.dot(keys.reshape(bt * ts, kdim), wk,
                 preferred_element_type=jnp.float32).reshape(bt, ts, -1)
    pq = jnp.dot(q, wq, preferred_element_type=jnp.float32)          # (BT, H)

    # --- energies: lane-dense (BT, TS) scores --------------------------------
    t = jnp.tanh(pk + pq[:, None, :])                                # (BT, TS, H)
    e = jnp.sum(t * we, axis=-1)                                     # (BT, TS)
    e = jnp.where(msk != 0, e, -jnp.inf)

    e_sc[si] = e   # keep the raw masked scores for the exact alphas at finalize

    # --- online (flash-style) softmax accumulation over the S grid axis ------
    m_prev = m_sc[...]                                               # (BT, 1)
    m_new = jnp.maximum(m_prev, jnp.max(e, axis=-1, keepdims=True))
    m_new = jnp.maximum(m_new, jnp.finfo(jnp.float32).min)           # all-masked guard
    corr = jnp.exp(m_prev - m_new)                                   # (BT, 1)
    p = jnp.exp(e - m_new)                                           # (BT, TS); masked -> 0
    l_sc[...] = corr * l_sc[...] + jnp.sum(p, axis=-1, keepdims=True)
    # VPU multiply + sublane reduce (M=1 MXU matvec is drain-dominated on v5e/v6e)
    acc_sc[...] = corr * acc_sc[...] + jnp.sum(p[:, :, None] * vals, axis=1)
    m_sc[...] = m_new

    @pl.when(si == n_s - 1)
    def _finalize():
        l = l_sc[...]
        denom = jnp.where(l > 0.0, l, 1.0)                           # all-masked guard
        inv = pl.reciprocal(denom, approx=False)                     # (BT, 1)
        m_fin = m_sc[...]
        ctx_ref[...] = (acc_sc[...] * inv).astype(ctx_ref.dtype)
        for j in range(n_s):   # static unroll -> static, lane-dense stores
            alpha_ref[:, j * ts:(j + 1) * ts] = (
                jnp.exp(e_sc[j] - m_fin) * inv).astype(alpha_ref.dtype)


def bahdanau_attention(query, mask, keys, values, w_key, w_query, w_energy):
    """
    query:  (B, 1, Q) float32
    mask:   (B, 1, S) bool  (True == valid)
    keys:   (B, S, K) float32
    values: (B, S, K) float32
    w_key:    (K, H)  (= torch key_layer.weight.T)
    w_query:  (Q, H)  (= torch query_layer.weight.T)
    w_energy: (H, 1)  (= torch energy_layer.weight.T)
    returns: context (B, 1, K), alphas (B, 1, S)
    """
    B, _, Q = query.shape
    _, S, K = keys.shape
    H = w_key.shape[1]

    BT, TS, B_pad, S_pad = _select_tiles(B, S, K, Q, H)
    n_b, n_s = B_pad // BT, S_pad // TS

    # Squeeze the size-1 query/mask dims at the boundary (sublane-dense blocks).
    q2 = query.reshape(B, Q)
    m2 = mask.reshape(B, S).astype(jnp.int32)
    k3 = keys
    v3 = values

    pad_b, pad_s = B_pad - B, S_pad - S
    if pad_b or pad_s:
        q2 = jnp.pad(q2, ((0, pad_b), (0, 0)))
        m2 = jnp.pad(m2, ((0, pad_b), (0, pad_s)))     # pad rows fully masked
        k3 = jnp.pad(k3, ((0, pad_b), (0, pad_s), (0, 0)))
        v3 = jnp.pad(v3, ((0, pad_b), (0, pad_s), (0, 0)))

    w_e_row = w_energy.reshape(1, H)                    # lane-dense energy weights

    grid_spec = pltpu.PrefetchScalarGridSpec(
        num_scalar_prefetch=0,
        grid=(n_b, n_s),
        in_specs=[
            pl.BlockSpec((BT, Q), lambda b, s: (b, 0)),          # query
            pl.BlockSpec((BT, TS, K), lambda b, s: (b, s, 0)),   # keys
            pl.BlockSpec((BT, TS, K), lambda b, s: (b, s, 0)),   # values
            pl.BlockSpec((BT, TS), lambda b, s: (b, s)),         # mask (int32)
            pl.BlockSpec((K, H), lambda b, s: (0, 0)),           # W_k
            pl.BlockSpec((Q, H), lambda b, s: (0, 0)),           # W_q
            pl.BlockSpec((1, H), lambda b, s: (0, 0)),           # W_e (row form)
        ],
        out_specs=[
            pl.BlockSpec((BT, K), lambda b, s: (b, 0)),          # context
            pl.BlockSpec((BT, S_pad), lambda b, s: (b, 0)),      # alphas (lane-dense)
        ],
        scratch_shapes=[
            pltpu.VMEM((n_s, BT, TS), jnp.float32),   # e_sc: raw masked scores
            pltpu.VMEM((BT, K), jnp.float32),         # acc_sc: context accumulator
            pltpu.VMEM((BT, 1), jnp.float32),         # m_sc: running max
            pltpu.VMEM((BT, 1), jnp.float32),         # l_sc: running denominator
        ],
    )

    flops = (2 * B_pad * S_pad * K * H        # key projection
             + 2 * B_pad * Q * H              # query projection
             + 4 * B_pad * S_pad * H          # add + energy multiply-reduce
             + 3 * B_pad * S_pad * K          # context multiply-reduce + rescale
             + 6 * B_pad * S_pad)             # softmax elementwise
    transcendentals = B_pad * S_pad * (H + 2)  # tanh + exp
    bytes_accessed = 4 * (2 * B_pad * S_pad * K + B_pad * S_pad + B_pad * Q
                          + K * H + Q * H + H + B_pad * K + B_pad * S_pad)

    ctx_p, alp_p = pl.pallas_call(
        functools.partial(bahdanau_kernel, n_s=n_s),
        out_shape=(
            jax.ShapeDtypeStruct((B_pad, K), jnp.float32),
            jax.ShapeDtypeStruct((B_pad, S_pad), jnp.float32),
        ),
        grid_spec=grid_spec,
        compiler_params=pltpu.CompilerParams(
            dimension_semantics=("parallel", "arbitrary"),
            vmem_limit_bytes=_VMEM_LIMIT),
        cost_estimate=pl.CostEstimate(
            flops=int(flops),
            transcendentals=int(transcendentals),
            bytes_accessed=int(bytes_accessed)),
    )(q2, k3, v3, m2, w_key, w_query, w_e_row)

    # Free metadata reshapes back to the module's (B, 1, *) interface.
    context = ctx_p[:B].reshape(B, 1, K)
    alphas = alp_p[:B, :S].reshape(B, 1, S)
    return context, alphas


def bahdanau_reference(query, mask, keys, values, w_key, w_query, w_energy):
    pk = jnp.einsum("bsk,kh->bsh", keys, w_key)
    pq = jnp.einsum("boq,qh->boh", query, w_query)
    scores = jnp.einsum("bsh,ho->bso", jnp.tanh(pq + pk), w_energy)  # (B, S, 1)
    scores = jnp.transpose(scores, (0, 2, 1))                        # (B, 1, S)
    scores = jnp.where(mask, scores, -jnp.inf)
    alphas = jax.nn.softmax(scores, axis=-1)
    context = jnp.einsum("bos,bsk->bok", alphas, values)
    return context, alphas


if __name__ == "__main__":
    # small shapes: batch=2, src_length=8, key_size=16, query_size=32, hidden=32
    B, S, K, Q, H = 2, 8, 16, 32, 32

    key = jax.random.PRNGKey(0)
    k1, k2, k3, k4, k5, k6 = jax.random.split(key, 6)

    query = jax.random.normal(k1, (B, 1, Q), dtype=jnp.float32)
    keys = jax.random.normal(k2, (B, S, K), dtype=jnp.float32)
    values = keys  # forward asserts values.shape[2] == key_size; reuse encoder states

    # mask: first `length[b]` positions valid (at least one valid per row)
    lengths = jnp.array([S, S // 2], dtype=jnp.int32)
    mask = (jnp.arange(S)[None, None, :] < lengths[:, None, None])  # (B, 1, S) bool

    # deterministic parameter init (nn.Linear-style uniform(-1/sqrt(in), 1/sqrt(in)))
    w_key = jax.random.uniform(k4, (K, H), jnp.float32,
                               -1.0 / jnp.sqrt(K), 1.0 / jnp.sqrt(K))
    w_query = jax.random.uniform(k5, (Q, H), jnp.float32,
                                 -1.0 / jnp.sqrt(Q), 1.0 / jnp.sqrt(Q))
    w_energy = jax.random.uniform(k6, (H, 1), jnp.float32,
                                  -1.0 / jnp.sqrt(H), 1.0 / jnp.sqrt(H))

    context, alphas = bahdanau_attention(query, mask, keys, values,
                                         w_key, w_query, w_energy)
    jax.block_until_ready((context, alphas))

    ctx_ref, alp_ref = bahdanau_reference(query, mask, keys, values,
                                          w_key, w_query, w_energy)
    assert context.shape == (B, 1, K) and alphas.shape == (B, 1, S)
    assert jnp.allclose(context, ctx_ref, atol=1e-5, rtol=1e-5)
    assert jnp.allclose(alphas, alp_ref, atol=1e-5, rtol=1e-5)

    print("KERNEL_OK")
</pallas_src>

<mosaic_0001>
module attributes {stable_mosaic.version = 11 : i64} {
  func.func @bahdanau_kernel(%arg0: i32, %arg1: i32, %arg2: memref<8x32xf32, #tpu.memory_space<vmem>>, %arg3: memref<8x8x16xf32, #tpu.memory_space<vmem>>, %arg4: memref<8x8x16xf32, #tpu.memory_space<vmem>>, %arg5: memref<8x8xi32, #tpu.memory_space<vmem>>, %arg6: memref<16x32xf32, #tpu.memory_space<vmem>>, %arg7: memref<32x32xf32, #tpu.memory_space<vmem>>, %arg8: memref<1x32xf32, #tpu.memory_space<vmem>>, %arg9: memref<8x16xf32, #tpu.memory_space<vmem>>, %arg10: memref<8x8xf32, #tpu.memory_space<vmem>>, %arg11: memref<1x8x8xf32, #tpu.memory_space<vmem>>, %arg12: memref<8x16xf32, #tpu.memory_space<vmem>>, %arg13: memref<8x1xf32, #tpu.memory_space<vmem>>, %arg14: memref<8x1xf32, #tpu.memory_space<vmem>>) attributes {dimension_semantics = [#tpu.dimension_semantics<parallel>, #tpu.dimension_semantics<arbitrary>], iteration_bounds = array<i64: 1, 1>, scalar_prefetch = 0 : i64, scratch_operands = 4 : i64, tpu.core_type = #tpu.core_type<tc>, window_params = [{transform_indices = @transform_0, window_bounds = array<i64: 8, 32>}, {transform_indices = @transform_1, window_bounds = array<i64: 8, 8, 16>}, {transform_indices = @transform_2, window_bounds = array<i64: 8, 8, 16>}, {transform_indices = @transform_3, window_bounds = array<i64: 8, 8>}, {pipeline_mode = #tpu.pipeline_mode<synchronous>, transform_indices = @transform_4, window_bounds = array<i64: 16, 32>}, {pipeline_mode = #tpu.pipeline_mode<synchronous>, transform_indices = @transform_5, window_bounds = array<i64: 32, 32>}, {pipeline_mode = #tpu.pipeline_mode<synchronous>, transform_indices = @transform_6, window_bounds = array<i64: 1, 32>}, {transform_indices = @transform_7, window_bounds = array<i64: 8, 16>}, {transform_indices = @transform_8, window_bounds = array<i64: 8, 8>}]} {
    %c0_i32 = arith.constant 0 : i32
    %0 = arith.cmpi eq, %arg1, %c0_i32 : i32
    %1 = arith.extui %0 : i1 to i32
    %c0_i32_0 = arith.constant 0 : i32
    %2 = arith.cmpi ne, %1, %c0_i32_0 : i32
    scf.if %2 {
      %cst_40 = arith.constant 0xFF800000 : f32
      %60 = vector.broadcast %cst_40 : f32 to vector<8x1xf32>
      %c0_41 = arith.constant 0 : index
      %c0_42 = arith.constant 0 : index
      %61 = vector.load %arg13[%c0_41, %c0_42] : memref<8x1xf32, #tpu.memory_space<vmem>>, vector<8x1xf32>
      tpu.vector_store %arg13[%c0_41, %c0_42], %60 {strides = array<i32>} : memref<8x1xf32, #tpu.memory_space<vmem>>, vector<8x1xf32>,
      %cst_43 = arith.constant 0.000000e+00 : f32
      %62 = vector.broadcast %cst_43 : f32 to vector<8x1xf32>
      %c0_44 = arith.constant 0 : index
      %c0_45 = arith.constant 0 : index
      %63 = vector.load %arg14[%c0_44, %c0_45] : memref<8x1xf32, #tpu.memory_space<vmem>>, vector<8x1xf32>
      tpu.vector_store %arg14[%c0_44, %c0_45], %62 {strides = array<i32>} : memref<8x1xf32, #tpu.memory_space<vmem>>, vector<8x1xf32>,
      %cst_46 = arith.constant 0.000000e+00 : f32
      %64 = vector.broadcast %cst_46 : f32 to vector<8x16xf32>
      %c0_47 = arith.constant 0 : index
      %c0_48 = arith.constant 0 : index
      %65 = vector.load %arg12[%c0_47, %c0_48] : memref<8x16xf32, #tpu.memory_space<vmem>>, vector<8x16xf32>
      tpu.vector_store %arg12[%c0_47, %c0_48], %64 {strides = array<i32>} : memref<8x16xf32, #tpu.memory_space<vmem>>, vector<8x16xf32>,
    } else {
    }
    %c0 = arith.constant 0 : index
    %c0_1 = arith.constant 0 : index
    %c0_2 = arith.constant 0 : index
    %3 = vector.load %arg3[%c0, %c0_1, %c0_2] : memref<8x8x16xf32, #tpu.memory_space<vmem>>, vector<8x8x16xf32>
    %c0_3 = arith.constant 0 : index
    %c0_4 = arith.constant 0 : index
    %c0_5 = arith.constant 0 : index
    %4 = vector.load %arg4[%c0_3, %c0_4, %c0_5] : memref<8x8x16xf32, #tpu.memory_space<vmem>>, vector<8x8x16xf32>
    %c0_6 = arith.constant 0 : index
    %c0_7 = arith.constant 0 : index
    %5 = vector.load %arg2[%c0_6, %c0_7] : memref<8x32xf32, #tpu.memory_space<vmem>>, vector<8x32xf32>
    %c0_8 = arith.constant 0 : index
    %c0_9 = arith.constant 0 : index
    %6 = vector.load %arg5[%c0_8, %c0_9] : memref<8x8xi32, #tpu.memory_space<vmem>>, vector<8x8xi32>
    %c0_10 = arith.constant 0 : index
    %c0_11 = arith.constant 0 : index
    %7 = vector.load %arg6[%c0_10, %c0_11] : memref<16x32xf32, #tpu.memory_space<vmem>>, vector<16x32xf32>
    %c0_12 = arith.constant 0 : index
    %c0_13 = arith.constant 0 : index
    %8 = vector.load %arg7[%c0_12, %c0_13] : memref<32x32xf32, #tpu.memory_space<vmem>>, vector<32x32xf32>
    %c0_14 = arith.constant 0 : index
    %c0_15 = arith.constant 0 : index
    %9 = vector.load %arg8[%c0_14, %c0_15] : memref<1x32xf32, #tpu.memory_space<vmem>>, vector<1x32xf32>
    %10 = vector.shape_cast %3 : vector<8x8x16xf32> to vector<64x16xf32>
    %cst = arith.constant dense<0.000000e+00> : vector<64x32xf32>
    %11 = tpu.matmul %10, %7, %cst {dimension_numbers = #tpu.dot_dimension_numbers<[1], [0], [0], [1], [0, 0, 1, 1], [], []>} : vector<64x16xf32>, vector<16x32xf32>, vector<64x32xf32> -> vector<64x32xf32>
    %12 = vector.shape_cast %11 : vector<64x32xf32> to vector<8x8x32xf32>
    %cst_16 = arith.constant dense<0.000000e+00> : vector<8x32xf32>
    %13 = tpu.matmul %5, %8, %cst_16 {dimension_numbers = #tpu.dot_dimension_numbers<[1], [0], [0], [1], [0, 0, 1, 1], [], []>} : vector<8x32xf32>, vector<32x32xf32>, vector<8x32xf32> -> vector<8x32xf32>
    %14 = vector.shape_cast %13 : vector<8x32xf32> to vector<8x1x32xf32>
    %15 = vector.broadcast %14 : vector<8x1x32xf32> to vector<8x8x32xf32>
    %16 = arith.addf %12, %15 : vector<8x8x32xf32>
    %17 = math.tanh %16 : vector<8x8x32xf32>
    %18 = vector.shape_cast %9 : vector<1x32xf32> to vector<1x1x32xf32>
    %19 = vector.broadcast %18 : vector<1x1x32xf32> to vector<8x8x32xf32>
    %20 = arith.mulf %17, %19 : vector<8x8x32xf32>
    %cst_17 = arith.constant dense<0.000000e+00> : vector<8x8xf32>
    %21 = vector.multi_reduction <add>, %20, %cst_17 [2] : vector<8x8x32xf32> to vector<8x8xf32>
    %c0_i32_18 = arith.constant 0 : i32
    %22 = vector.broadcast %c0_i32_18 : i32 to vector<8x8xi32>
    %23 = arith.cmpi ne, %6, %22 : vector<8x8xi32>
    %cst_19 = arith.constant 0xFF800000 : f32
    %24 = vector.broadcast %cst_19 : f32 to vector<8x8xf32>
    %25 = arith.select %23, %21, %24 : vector<8x8xi1>, vector<8x8xf32>
    %26 = arith.index_cast %arg1 : i32 to index
    %c0_20 = arith.constant 0 : index
    %c0_21 = arith.constant 0 : index
    %27 = vector.load %arg11[%26, %c0_20, %c0_21] : memref<1x8x8xf32, #tpu.memory_space<vmem>>, vector<1x8x8xf32>
    %28 = vector.shape_cast %27 : vector<1x8x8xf32> to vector<8x8xf32>
    %29 = vector.shape_cast %25 : vector<8x8xf32> to vector<1x8x8xf32>
    tpu.vector_store %arg11[%26, %c0_20, %c0_21], %29 {strides = array<i32>} : memref<1x8x8xf32, #tpu.memory_space<vmem>>, vector<1x8x8xf32>,
    %c0_22 = arith.constant 0 : index
    %c0_23 = arith.constant 0 : index
    %30 = vector.load %arg13[%c0_22, %c0_23] : memref<8x1xf32, #tpu.memory_space<vmem>>, vector<8x1xf32>
    %cst_24 = arith.constant dense<0xFF800000> : vector<8xf32>
    %31 = vector.multi_reduction <maximumf>, %25, %cst_24 [1] : vector<8x8xf32> to vector<8xf32>
    %32 = vector.shape_cast %31 : vector<8xf32> to vector<8x1xf32>
    %33 = arith.maximumf %30, %32 : vector<8x1xf32>
    %cst_25 = arith.constant -3.40282347E+38 : f32
    %34 = vector.broadcast %cst_25 : f32 to vector<8x1xf32>
    %35 = arith.maximumf %33, %34 : vector<8x1xf32>
    %36 = arith.subf %30, %35 : vector<8x1xf32>
    %37 = math.exp %36 : vector<8x1xf32>
    %38 = vector.broadcast %35 : vector<8x1xf32> to vector<8x8xf32>
    %39 = arith.subf %25, %38 : vector<8x8xf32>
    %40 = math.exp %39 : vector<8x8xf32>
    %c0_26 = arith.constant 0 : index
    %c0_27 = arith.constant 0 : index
    %41 = vector.load %arg14[%c0_26, %c0_27] : memref<8x1xf32, #tpu.memory_space<vmem>>, vector<8x1xf32>
    %42 = arith.mulf %37, %41 : vector<8x1xf32>
    %cst_28 = arith.constant dense<0.000000e+00> : vector<8xf32>
    %43 = vector.multi_reduction <add>, %40, %cst_28 [1] : vector<8x8xf32> to vector<8xf32>
    %44 = vector.shape_cast %43 : vector<8xf32> to vector<8x1xf32>
    %45 = arith.addf %42, %44 : vector<8x1xf32>
    %c0_29 = arith.constant 0 : index
    %c0_30 = arith.constant 0 : index
    %46 = vector.load %arg14[%c0_29, %c0_30] : memref<8x1xf32, #tpu.memory_space<vmem>>, vector<8x1xf32>
    tpu.vector_store %arg14[%c0_29, %c0_30], %45 {strides = array<i32>} : memref<8x1xf32, #tpu.memory_space<vmem>>, vector<8x1xf32>,
    %c0_31 = arith.constant 0 : index
    %c0_32 = arith.constant 0 : index
    %47 = vector.load %arg12[%c0_31, %c0_32] : memref<8x16xf32, #tpu.memory_space<vmem>>, vector<8x16xf32>
    %48 = vector.broadcast %37 : vector<8x1xf32> to vector<8x16xf32>
    %49 = arith.mulf %48, %47 : vector<8x16xf32>
    %50 = vector.shape_cast %40 : vector<8x8xf32> to vector<8x8x1xf32>
    %51 = vector.broadcast %50 : vector<8x8x1xf32> to vector<8x8x16xf32>
    %52 = arith.mulf %51, %4 : vector<8x8x16xf32>
    %cst_33 = arith.constant dense<0.000000e+00> : vector<8x16xf32>
    %53 = vector.multi_reduction <add>, %52, %cst_33 [1] : vector<8x8x16xf32> to vector<8x16xf32>
    %54 = arith.addf %49, %53 : vector<8x16xf32>
    %c0_34 = arith.constant 0 : index
    %c0_35 = arith.constant 0 : index
    %55 = vector.load %arg12[%c0_34, %c0_35] : memref<8x16xf32, #tpu.memory_space<vmem>>, vector<8x16xf32>
    tpu.vector_store %arg12[%c0_34, %c0_35], %54 {strides = array<i32>} : memref<8x16xf32, #tpu.memory_space<vmem>>, vector<8x16xf32>,
    %c0_36 = arith.constant 0 : index
    %c0_37 = arith.constant 0 : index
    %56 = vector.load %arg13[%c0_36, %c0_37] : memref<8x1xf32, #tpu.memory_space<vmem>>, vector<8x1xf32>
    tpu.vector_store %arg13[%c0_36, %c0_37], %35 {strides = array<i32>} : memref<8x1xf32, #tpu.memory_space<vmem>>, vector<8x1xf32>,
    %c0_i32_38 = arith.constant 0 : i32
    %57 = arith.cmpi eq, %arg1, %c0_i32_38 : i32
    %58 = arith.extui %57 : i1 to i32
    %c0_i32_39 = arith.constant 0 : i32
    %59 = arith.cmpi ne, %58, %c0_i32_39 : i32
    scf.if %59 {
      %c0_40 = arith.constant 0 : index
      %c0_41 = arith.constant 0 : index
      %60 = vector.load %arg14[%c0_40, %c0_41] : memref<8x1xf32, #tpu.memory_space<vmem>>, vector<8x1xf32>
      %cst_42 = arith.constant 0.000000e+00 : f32
      %61 = vector.broadcast %cst_42 : f32 to vector<8x1xf32>
      %62 = arith.cmpf ogt, %60, %61 : vector<8x1xf32>
      %cst_43 = arith.constant 1.000000e+00 : f32
      %63 = vector.broadcast %cst_43 : f32 to vector<8x1xf32>
      %64 = arith.select %62, %60, %63 : vector<8x1xi1>, vector<8x1xf32>
      %65 = tpu.reciprocal %64 : vector<8x1xf32> -> vector<8x1xf32>
      %c0_44 = arith.constant 0 : index
      %c0_45 = arith.constant 0 : index
      %66 = vector.load %arg13[%c0_44, %c0_45] : memref<8x1xf32, #tpu.memory_space<vmem>>, vector<8x1xf32>
      %c0_46 = arith.constant 0 : index
      %c0_47 = arith.constant 0 : index
      %67 = vector.load %arg12[%c0_46, %c0_47] : memref<8x16xf32, #tpu.memory_space<vmem>>, vector<8x16xf32>
      %68 = vector.broadcast %65 : vector<8x1xf32> to vector<8x16xf32>
      %69 = arith.mulf %67, %68 : vector<8x16xf32>
      %c0_48 = arith.constant 0 : index
      %c0_49 = arith.constant 0 : index
      %70 = vector.load %arg9[%c0_48, %c0_49] : memref<8x16xf32, #tpu.memory_space<vmem>>, vector<8x16xf32>
      tpu.vector_store %arg9[%c0_48, %c0_49], %69 {strides = array<i32>} : memref<8x16xf32, #tpu.memory_space<vmem>>, vector<8x16xf32>,
      %c0_50 = arith.constant 0 : index
      %c0_51 = arith.constant 0 : index
      %c0_52 = arith.constant 0 : index
      %71 = vector.load %arg11[%c0_50, %c0_51, %c0_52] : memref<1x8x8xf32, #tpu.memory_space<vmem>>, vector<1x8x8xf32>
      %72 = vector.shape_cast %71 : vector<1x8x8xf32> to vector<8x8xf32>
      %73 = vector.broadcast %66 : vector<8x1xf32> to vector<8x8xf32>
      %74 = arith.subf %72, %73 : vector<8x8xf32>
      %75 = math.exp %74 : vector<8x8xf32>
      %76 = vector.broadcast %65 : vector<8x1xf32> to vector<8x8xf32>
      %77 = arith.mulf %75, %76 : vector<8x8xf32>
      %c0_53 = arith.constant 0 : index
      %c0_54 = arith.constant 0 : index
      %78 = vector.load %arg10[%c0_53, %c0_54] : memref<8x8xf32, #tpu.memory_space<vmem>>, vector<8x8xf32>
      tpu.vector_store %arg10[%c0_53, %c0_54], %77 {strides = array<i32>} : memref<8x8xf32, #tpu.memory_space<vmem>>, vector<8x8xf32>,
    } else {
    }
    return
  }
  func.func @transform_0(%arg0: i32, %arg1: i32) -> (i32, i32) {
    %c0_i32 = arith.constant 0 : i32
    %c0_i32_0 = arith.constant 0 : i32
    return %arg0, %c0_i32 : i32, i32
  }
  func.func @transform_1(%arg0: i32, %arg1: i32) -> (i32, i32, i32) {
    %c0_i32 = arith.constant 0 : i32
    %c0_i32_0 = arith.constant 0 : i32
    return %arg0, %arg1, %c0_i32 : i32, i32, i32
  }
  func.func @transform_2(%arg0: i32, %arg1: i32) -> (i32, i32, i32) {
    %c0_i32 = arith.constant 0 : i32
    %c0_i32_0 = arith.constant 0 : i32
    return %arg0, %arg1, %c0_i32 : i32, i32, i32
  }
  func.func @transform_3(%arg0: i32, %arg1: i32) -> (i32, i32) {
    %c0_i32 = arith.constant 0 : i32
    return %arg0, %arg1 : i32, i32
  }
  func.func @transform_4(%arg0: i32, %arg1: i32) -> (i32, i32) {
    %c0_i32 = arith.constant 0 : i32
    %c0_i32_0 = arith.constant 0 : i32
    %c0_i32_1 = arith.constant 0 : i32
    return %c0_i32, %c0_i32_0 : i32, i32
  }
  func.func @transform_5(%arg0: i32, %arg1: i32) -> (i32, i32) {
    %c0_i32 = arith.constant 0 : i32
    %c0_i32_0 = arith.constant 0 : i32
    %c0_i32_1 = arith.constant 0 : i32
    return %c0_i32, %c0_i32_0 : i32, i32
  }
  func.func @transform_6(%arg0: i32, %arg1: i32) -> (i32, i32) {
    %c0_i32 = arith.constant 0 : i32
    %c0_i32_0 = arith.constant 0 : i32
    %c0_i32_1 = arith.constant 0 : i32
    return %c0_i32, %c0_i32_0 : i32, i32
  }
  func.func @transform_7(%arg0: i32, %arg1: i32) -> (i32, i32) {
    %c0_i32 = arith.constant 0 : i32
    %c0_i32_0 = arith.constant 0 : i32
    return %arg0, %c0_i32 : i32, i32
  }
  func.func @transform_8(%arg0: i32, %arg1: i32) -> (i32, i32) {
    %c0_i32 = arith.constant 0 : i32
    %c0_i32_0 = arith.constant 0 : i32
    return %arg0, %c0_i32 : i32, i32
  }
}

</mosaic_0001>

<bundles_post_ra>
// kernel: tpu_custom_call.1
= control target key start
LH: loop header
LB: loop body
LE: loop exit
PB: predicated region body
PF: predicated region fallthrough
CT: control target
= control target key end

     0   :  { %14 = vsyncpa [#allocation7], 0  ;;  %s1274_s0 = inlined_call_operand.hbm [shape: f32[8,32], index: 0, kind: input, shape index: {}]   ;;  %s1275_s1 = inlined_call_operand.hbm [shape: f32[8,8,16], index: 1, kind: input, shape index: {}]   ;;  %s1276_s2 = inlined_call_operand.hbm [shape: f32[8,8,16], index: 2, kind: input, shape index: {}]   ;;  %s1277_s3 = inlined_call_operand.vmem [shape: s32[8,8], index: 3, kind: input, shape index: {}]   ;;  %s1278_s4 = inlined_call_operand.hbm [shape: f32[16,32], index: 4, kind: input, shape index: {}]   ;;  %s1279_s5 = inlined_call_operand.hbm [shape: f32[32,32], index: 5, kind: input, shape index: {}]   ;;  %s1280_s6 = inlined_call_operand.vmem [shape: f32[1,32], index: 6, kind: input, shape index: {}]   ;;  %s1281_s7 = inlined_call_operand.hbm [shape: f32[8,16], index: 7, kind: output, shape index: {0}]   ;;  %s1282_s8 = inlined_call_operand.hbm [shape: f32[8,8], index: 8, kind: output, shape index: {1}]  }
   0x1   :  { %15 = vsyncpa [#allocation10], 0 }
   0x2   :  { %16 = vsyncpa [#allocation13], 0 }
   0x3   :  { %17 = vsyncpa [#allocation8], 0 }
   0x4   :  { %18 = vsyncpa [#allocation17], 0  ;;  %s1037_s27 = smov [#allocation9]   ;;  %s873_s9 = scalar_lea.hbm %s1275_s1, 1024 }
   0x5   :  { %s34_s28 = sshll.u32 %s1037_s27, 4  ;;  %p874_p0 = scmp.ne.s32.totalorder %s1275_s1, %s873_s9  ;;  %s35_s28 = int_to_ptr.vmem [resolvable:$true] %s34_s28 }
   0x6   :  { %p877_p1 = scmp.lt.u32.totalorder %s873_s9, %s1275_s1 }
   0x8   :  { %p879_p2 = pnand %p877_p1, %p874_p0 }
   0xa   :  { %882 = shalt.err (!%p879_p2)
}
   0xb   :  { %s883_s14 = scalar_lea.vmem %s35_s28, 1024  ;;  %p888_p4 = scmp.lt.s32.totalorder %s35_s28, %s35_s28 }
   0xc   :  { %p884_p3 = scmp.ne.s32.totalorder %s35_s28, %s883_s14  ;;  %p889_p5 = scmp.lt.s32.totalorder %s883_s14, %s883_s14 }
   0xe   :  { %p890_p6 = por %p889_p5, %p888_p4 }
  0x10   :  { %p891_p7 = pnand %p890_p6, %p884_p3 }
  0x12   :  { %894 = shalt.err (!%p891_p7)
}
  0x13   :  { %s1038_s15 = smov 128   ;;  %s1039_s16 = smov 8  }
  0x14   :  { %40 = dma.hbm_to_vmem [thread:$0]  %s1275_s1, 1024, %s35_s28, [#allocation10], %s1038_s15, %s1038_s15, %s1039_s16  }
  0x15   :  { %s1040_s19 = smov [#allocation12]   ;;  %s1041_s21 = smov [#allocation6]  }
  0x16   :  { %s60_s20 = sshll.u32 %s1040_s19, 4  ;;  %s25_s22 = sshll.u32 %s1041_s21, 4  ;;  %s61_s20 = int_to_ptr.vmem [resolvable:$true] %s60_s20  ;;  %s26_s22 = int_to_ptr.vmem [resolvable:$true] %s25_s22 }
  0x17   :  { %s895_s25 = scalar_lea.hbm %s1278_s4, 256 }
  0x18   :  { %p896_p8 = scmp.ne.s32.totalorder %s1278_s4, %s895_s25  ;;  %p899_p9 = scmp.lt.u32.totalorder %s895_s25, %s1278_s4 }
  0x1a   :  { %p901_p10 = pnand %p899_p9, %p896_p8 }
  0x1c   :  { %904 = shalt.err (!%p901_p10)
}
  0x1d   :  { %s905_s1 = scalar_lea.vmem %s61_s20, 256  ;;  %p910_p12 = scmp.lt.s32.totalorder %s61_s20, %s61_s20 }
  0x1e   :  { %p906_p11 = scmp.ne.s32.totalorder %s61_s20, %s905_s1  ;;  %p911_p13 = scmp.lt.s32.totalorder %s905_s1, %s905_s1 }
  0x20   :  { %p912_p0 = por %p911_p13, %p910_p12 }
  0x22   :  { %p913_p1 = pnand %p912_p0, %p906_p11 }
  0x24   :  { %916 = shalt.err (!%p913_p1)
}
  0x25   :  { %66 = dma.hbm_to_vmem [thread:$0]  %s1278_s4, 256, %s61_s20, [#allocation13], %s1038_s15, %s1038_s15, %s1039_s16  }
  0x26   :  { %s917_s12 = scalar_lea.hbm %s1274_s0, 128 }
  0x27   :  { %p918_p2 = scmp.ne.s32.totalorder %s1274_s0, %s917_s12  ;;  %p921_p3 = scmp.lt.u32.totalorder %s917_s12, %s1274_s0 }
  0x29   :  { %p923_p4 = pnand %p921_p3, %p918_p2 }
  0x2b   :  { %926 = shalt.err (!%p923_p4)
}
  0x2c   :  { %s927_s19 = scalar_lea.vmem %s26_s22, 128  ;;  %p932_p6 = scmp.lt.s32.totalorder %s26_s22, %s26_s22 }
  0x2d   :  { %p928_p5 = scmp.ne.s32.totalorder %s26_s22, %s927_s19  ;;  %p933_p7 = scmp.lt.s32.totalorder %s927_s19, %s927_s19 }
  0x2f   :  { %p934_p8 = por %p933_p7, %p932_p6 }
  0x31   :  { %p935_p9 = pnand %p934_p8, %p928_p5 }
  0x33   :  { %938 = shalt.err (!%p935_p9)
}
  0x34   :  { %28 = dma.hbm_to_vmem [thread:$0]  %s1274_s0, 128, %s26_s22, [#allocation7]  }
  0x35   :  { %s1042_s21 = smov [#allocation11]   ;;  %s1043_s24 = smov [#allocation14]  }
  0x36   :  { %s46_s23 = sshll.u32 %s1042_s21, 4  ;;  %s72_s25 = sshll.u32 %s1043_s24, 4  ;;  %s47_s23 = int_to_ptr.vmem [resolvable:$true] %s46_s23  ;;  %s73_s25 = int_to_ptr.vmem [resolvable:$true] %s72_s25 }
  0x37   :  { %s939_s29 = scalar_lea.hbm %s1276_s2, 1024 }
  0x38   :  { %p940_p10 = scmp.ne.s32.totalorder %s1276_s2, %s939_s29  ;;  %p943_p11 = scmp.lt.u32.totalorder %s939_s29, %s1276_s2 }
  0x3a   :  { %p945_p12 = pnand %p943_p11, %p940_p10 }
  0x3c   :  { %948 = shalt.err (!%p945_p12)
}
  0x3d   :  { %s949_s0 = scalar_lea.vmem %s47_s23, 1024  ;;  %p954_p0 = scmp.lt.s32.totalorder %s47_s23, %s47_s23 }
  0x3e   :  { %p950_p13 = scmp.ne.s32.totalorder %s47_s23, %s949_s0  ;;  %p955_p1 = scmp.lt.s32.totalorder %s949_s0, %s949_s0 }
  0x40   :  { %p956_p2 = por %p955_p1, %p954_p0 }
  0x42   :  { %p957_p3 = pnand %p956_p2, %p950_p13 }
  0x44   :  { %960 = shalt.err (!%p957_p3)
}
  0x45   :  { %52 = dma.hbm_to_vmem [thread:$0]  %s1276_s2, 1024, %s47_s23, [#allocation10], %s1038_s15, %s1038_s15, %s1039_s16  }
  0x46   :  { %s961_s13 = scalar_lea.hbm %s1279_s5, 512 }
  0x47   :  { %p962_p4 = scmp.ne.s32.totalorder %s1279_s5, %s961_s13  ;;  %p965_p5 = scmp.lt.u32.totalorder %s961_s13, %s1279_s5 }
  0x49   :  { %p967_p6 = pnand %p965_p5, %p962_p4 }
  0x4b   :  { %970 = shalt.err (!%p967_p6)
}
  0x4c   :  { %s971_s4 = scalar_lea.vmem %s73_s25, 512  ;;  %p976_p8 = scmp.lt.s32.totalorder %s73_s25, %s73_s25 }
  0x4d   :  { %p972_p7 = scmp.ne.s32.totalorder %s73_s25, %s971_s4  ;;  %p977_p9 = scmp.lt.s32.totalorder %s971_s4, %s971_s4 }
  0x4f   :  { %p978_p10 = por %p977_p9, %p976_p8 }
  0x51   :  { %p979_p11 = pnand %p978_p10, %p972_p7 }
  0x53   :  { %982 = shalt.err (!%p979_p11)
}
  0x54   :  { %78 = dma.hbm_to_vmem [thread:$0]  %s1279_s5, 512, %s73_s25, [#allocation13], %s1038_s15, %s1038_s15, %s1039_s16  }
  0x55   :  { %1027 = dma.done.wait [#allocation7], 128  }
  0x56   :  { %1028 = vsyncadd [#allocation7], 4294967168 }
  0x57   :  { %1029 = dma.done.wait [#allocation10], 2048  }
  0x58   :  { %1030 = vsyncadd [#allocation10], 4294965248 }
  0x59   :  { %1031 = dma.done.wait [#allocation13], 768  }
  0x5a   :  { %1032 = vsyncadd [#allocation13], 4294966528  ;;  %vm100_vm0 = vcmask 7168   ;;  %v1044_v0 = vmov 0.0|0.0   ;;  %vm103_vm1 = vcmask 130048   ;;  %v1045_v1 = vmov -inf  }
  0x5b   :  { %826 = vmatprep.subr.bf16.mxu1 %v1044_v0  ;;  %101 = vst.msk [vmem:[#allocation4] sm:$0xff] %vm100_vm0, %v1045_v1  ;;  %v1046_v2 = vmov 0.0   ;;  %vm1047_vm2 = vmmov 0   ;;  %v123_v3 = vld [vmem:[#allocation12] sm:$0xff]  ;;  %v124_v4 = vld [vmem:[#allocation12 + $0x8] sm:$0xff]  ;;  %v125_v5 = vld [vmem:[#allocation14] sm:$0xff]  ;;  %v339_v23 = vlaneseq }
  0x5c   :  { %102 = vst.msk [vmem:[#allocation5] sm:$0xff] %vm100_vm0, %v1046_v2  ;;  %819 = vmatprep.mubr.msk.f32.mxu1 %vm1047_vm2, %v1046_v2  ;;  %v822_v6 = vpack.c.bf16 %v124_v4, %v123_v3  ;;  %v126_v7 = vld [vmem:[#allocation14 + $0x8] sm:$0xff]  ;;  %v105_v8 = vld [vmem:[#allocation9] sm:$0xff]  ;;  %v128_v11 = vld [vmem:[#allocation14 + $0x18] sm:$0xff]  ;;  %vm260_vm3 = vcmask 261120   ;;  %vm521_vm4 = vcmask 1041409  }
  0x5d   :  { %104 = vst.msk [vmem:[#allocation3] sm:$0xff] %vm103_vm1, %v1046_v2  ;;  %v827_v9 = vpack.c.bf16 %v126_v7, %v125_v5  ;;  %799 = vmatprep.mubr.msk.f32.mxu0 %vm103_vm1, %v105_v8  ;;  %v127_v10 = vld [vmem:[#allocation14 + $0x10] sm:$0xff]  ;;  %v106_v12 = vld [vmem:[#allocation9 + $0x8] sm:$0xff]  ;;  %v107_v14 = vld [vmem:[#allocation9 + $0x10] sm:$0xff]  ;;  %v1048_v21 = vmov 1966171168  }
  0x5e   :  { %823 = vmatprep.subr.bf16.mxu0 %v822_v6  ;;  %v830_v13 = vpack.c.bf16 %v128_v11, %v127_v10  ;;  %v121_v15 = vld [vmem:[#allocation6] sm:$0xff]  ;;  %v109_v17 = vld [vmem:[#allocation9 + $0x20] sm:$0xff]  ;;  %v110_v18 = vld [vmem:[#allocation9 + $0x28] sm:$0xff]  ;;  %v337_v22 = vunpack.c.l.s4 %v1048_v21  ;;  %v1182_v25 = vshrl.u32 %v339_v23, 7  ;;  %vm523_vm5 = vcmask 1042434   ;;  %s1051_s23 = smov [#allocation16]  }
  0x5f   :  { %828 = vmatpush3.bf16.msra.mxu1 %v827_v9  ;;  %825 = vmatpush3.bf16.msra.mxu0 %v822_v6  ;;  %v108_v16 = vld [vmem:[#allocation9 + $0x18] sm:$0xff]  ;;  %v111_v19 = vld [vmem:[#allocation9 + $0x30] sm:$0xff]  ;;  %vm525_vm6 = vcmask 1043459   ;;  %vm527_vm7 = vcmask 1044484   ;;  %vm529_vm8 = vcmask 1045509   ;;  %vm531_vm9 = vcmask 1046534  }
  0x60   :  { %829 = vmatprep.subr.bf16.mxu1 %v1044_v0  ;;  %v112_v20 = vld [vmem:[#allocation9 + $0x38] sm:$0xff]  ;;  %v338_v24 = vunpack.c.0.s8 %v337_v22  ;;  %v1186_v34 = vsub.s32 0, %v1182_v25  ;;  %vm533_vm10 = vcmask 1047559   ;;  %vm539_vm12 = vcmask 64512   ;;  %s755_s24 = sshll.u32 %s1051_s23, 4  ;;  %s756_s24 = int_to_ptr.vmem [resolvable:$true] %s755_s24 }
  0x61   :  { %v779_v3 = vld [vmem:[%s1280_s6] ss:$0 sm:$0xff] }
  0x62   :  { %800 = vmatmul.mubr.msk.f32.vlgmr.msra.gmra.mrb[0].mxu0 %vm103_vm1, %v106_v12  ;;  %v341_v27 = vsub.s32 %v338_v24, %v1182_v25 }
  0x63   :  { %831 = vmatpush3.bf16.msra.mxu1 %v830_v13  ;;  %802 = vmatprep.mubr.msk.f32.mxu0 %vm103_vm1, %v107_v14 }
  0x66   :  { %820 = vmatmul.mubr.msk.f32.vlgmr.msra.gmra.mrb[0].mxu1 %vm260_vm3, %v121_v15  ;;  %803 = vmatmul.mubr.msk.f32.gmra.mrb[2].mxu0 %vm103_vm1, %v108_v16 }
  0x67   :  { %805 = vmatprep.mubr.msk.f32.mxu0 %vm103_vm1, %v109_v17 }
  0x6a   :  { %806 = vmatmul.mubr.msk.f32.gmra.mrb[4].mxu0 %vm103_vm1, %v110_v18 }
  0x6b   :  { %808 = vmatprep.mubr.msk.f32.mxu0 %vm103_vm1, %v111_v19 }
  0x6e   :  { %809 = vmatmul.mubr.msk.f32.gmra.mrb[6].mxu0 %vm103_vm1, %v112_v20 }
 0x135   :  { %v801_v26 = vpop.f32.mrb[0].mxu0 }
 0x136   :  { %v221_v28 = vpop.f32.mrb[1].mxu0 }
 0x139   :  { %v330_v29 = vpop.f32.mrb[0].mxu1  ;;  %v804_v30 = vpop.f32.mrb[2].mxu0 }
 0x13a   :  { %v335_v31 = vcombine.high %v330_v29, %v330_v29  ;;  %v342_v32 = vrot.slane %v330_v29, %v341_v27  ;;  %v821_v33 = vpop.f32.mrb[1].mxu1  ;;  %v231_v35 = vpop.f32.mrb[3].mxu0 }
 0x13c   :  { %v349_v36 = vrot.slane %v335_v31, %v341_v27  ;;  %v350_v37 = vcombine.high %v342_v32, %v342_v32  ;;  %v358_v38 = vrot.slane %v342_v32, %v341_v27 }
 0x13d   :  { %v807_v39 = vpop.f32.mrb[4].mxu0 }
 0x13e   :  { %v351_v40 = vcombine.high %v349_v36, %v349_v36  ;;  %v372_v41 = vrot.slane %v350_v37, %v341_v27  ;;  %v387_v42 = vrot.slane %v358_v38, %v1186_v34  ;;  %v380_v43 = vcombine.high %v358_v38, %v358_v38  ;;  %v241_v44 = vpop.f32.mrb[5].mxu0 }
 0x13f   :  { %v365_v45 = vrot.slane %v349_v36, %v341_v27 }
 0x140   :  { %v391_v46 = vrot.slane %v372_v41, %v1186_v34  ;;  %v424_v47 = vadd.f32 %v387_v42, %v221_v28  ;;  %v382_v48 = vcombine.high %v372_v41, %v372_v41  ;;  %v395_v49 = vrot.slane %v380_v43, %v1186_v34 }
 0x141   :  { %v379_v50 = vrot.slane %v351_v40, %v341_v27  ;;  %v403_v51 = vrot.slane %v365_v45, %v1186_v34  ;;  %v810_v52 = vpop.f32.mrb[6].mxu0  ;;  %v381_v53 = vcombine.high %v365_v45, %v365_v45 }
 0x142   :  { %v425_v54 = vadd.f32 %v801_v26, %v391_v46  ;;  %849 = vtanh.f32 %v424_v47  ;;  %v399_v55 = vrot.slane %v382_v48, %v1186_v34  ;;  %v426_v56 = vadd.f32 %v395_v49, %v231_v35  ;;  %v251_v57 = vpop.f32.mrb[7].mxu0 }
 0x143   :  { %v407_v58 = vrot.slane %v379_v50, %v1186_v34  ;;  %v428_v59 = vadd.f32 %v403_v51, %v241_v44  ;;  %v383_v60 = vcombine.high %v379_v50, %v379_v50  ;;  %v411_v61 = vrot.slane %v381_v53, %v1186_v34  ;;  %v122_v50 = vld [vmem:[%s1277_s3] sm:$0xff]  ;;  %s1050_s3 = smov [#allocation15]  }
 0x144   :  { %851 = vtanh.f32 %v425_v54  ;;  %v427_v62 = vadd.f32 %v804_v30, %v399_v55  ;;  %v488_v30 = vand.u32 127, %v339_v23  ;;  %vm478_vm11 = vcmp.ne.s32.totalorder %v122_v50, 0  ;;  %s745_s21 = sshll.u32 %s1050_s3, 4  ;;  %s746_s21 = int_to_ptr.vmem [resolvable:$true] %s745_s21 }
 0x145   :  { %853 = vtanh.f32 %v426_v56  ;;  %v429_v63 = vadd.f32 %v807_v39, %v407_v58  ;;  %v415_v0 = vrot.slane %v383_v60, %v1186_v34  ;;  %v430_v1 = vadd.f32 %v411_v61, %v251_v57  ;;  %s983_s25 = scalar_lea.vmem %s746_s21, 128  ;;  %p988_p13 = scmp.lt.s32.totalorder %s746_s21, %s746_s21 }
 0x146   :  { %855 = vtanh.f32 %v427_v62  ;;  %v491_v32 = vsub.s32 %v488_v30, %v1182_v25  ;;  %v1049_v58 = vmov 0   ;;  %p984_p12 = scmp.ne.s32.totalorder %s746_s21, %s983_s25  ;;  %p989_p0 = scmp.lt.s32.totalorder %s983_s25, %s983_s25 }
 0x147   :  { %v431_v2 = vadd.f32 %v810_v52, %v415_v0  ;;  %857 = vtanh.f32 %v428_v59  ;;  %847 = vset.pattern.permute.xlu1 %v1049_v58  ;;  %848 = vset.pattern.permute.xlu0 %v1049_v58  ;;  %v541_v59 = vld [vmem:[#allocation4] sm:$0xff] }
 0x148   :  { %859 = vtanh.f32 %v429_v63  ;;  %p990_p1 = por %p989_p0, %p988_p13 }
 0x149   :  { %861 = vtanh.f32 %v430_v1 }
 0x14a   :  { %863 = vtanh.f32 %v431_v2  ;;  %p991_p2 = pnand %p990_p1, %p984_p12 }
 0x14c   :  { %v850_v4 = vpop.eup %849 }
 0x14d   :  { %v446_v5 = vmul.f32 %v850_v4, %v779_v3 }
 0x14e   :  { %v852_v6 = vpop.eup %851 }
 0x14f   :  { %v854_v7 = vpop.eup %853  ;;  %v454_v8 = vsel %vm260_vm3, %v446_v5, 0.0  ;;  %v447_v9 = vmul.f32 %v852_v6, %v779_v3 }
 0x150   :  { %v856_v10 = vpop.eup %855  ;;  %455 = vadd.xlane.f32.xlu0 %v454_v8  ;;  %v448_v11 = vmul.f32 %v854_v7, %v779_v3  ;;  %v589_v7 = vsub.s32 2, %v1182_v25 }
 0x151   :  { %v858_v12 = vpop.eup %857  ;;  %v449_v14 = vmul.f32 %v856_v10, %v779_v3  ;;  %v457_v16 = vsel %vm260_vm3, %v447_v9, 0.0  ;;  %v596_v9 = vsub.s32 3, %v1182_v25 }
 0x152   :  { %v460_v13 = vsel %vm260_vm3, %v448_v11, 0.0  ;;  %v860_v15 = vpop.eup %859  ;;  %v450_v17 = vmul.f32 %v858_v12, %v779_v3  ;;  %v603_v11 = vsub.s32 4, %v1182_v25 }
 0x153   :  { %461 = vadd.xlane.f32.xlu1 %v460_v13  ;;  %v862_v18 = vpop.eup %861  ;;  %v463_v19 = vsel %vm260_vm3, %v449_v14, 0.0  ;;  %v451_v20 = vmul.f32 %v860_v15, %v779_v3  ;;  %v617_v13 = vsub.s32 6, %v1182_v25 }
 0x154   :  { %458 = vadd.xlane.f32.xlu0 %v457_v16  ;;  %v864_v21 = vpop.eup %863  ;;  %v466_v22 = vsel %vm260_vm3, %v450_v17, 0.0  ;;  %v452_v24 = vmul.f32 %v862_v18, %v779_v3  ;;  %v610_v18 = vsub.s32 5, %v1182_v25 }
 0x155   :  { %v469_v26 = vsel %vm260_vm3, %v451_v20, 0.0  ;;  %v453_v27 = vmul.f32 %v864_v21, %v779_v3  ;;  %v582_v3 = vsub.s32 1, %v1182_v25  ;;  %v624_v20 = vsub.s32 7, %v1182_v25  ;;  %v119_v25 = vld [vmem:[#allocation11 + $0x30] sm:$0xff] }
 0x156   :  { %v472_v28 = vsel %vm260_vm3, %v452_v24, 0.0 }
 0x157   :  { %464 = vadd.xlane.f32.xlu1 %v463_v19  ;;  %v475_v29 = vsel %vm260_vm3, %v453_v27, 0.0 }
 0x158   :  { %467 = vadd.xlane.f32.xlu0 %v466_v22 }
 0x15b   :  { %470 = vadd.xlane.f32.xlu1 %v469_v26 }
 0x15c   :  { %473 = vadd.xlane.f32.xlu0 %v472_v28  ;;  %v114_v28 = vld [vmem:[#allocation11 + $0x8] sm:$0xff] }
 0x15f   :  { %476 = vadd.xlane.f32.xlu1 %v475_v29  ;;  %v115_v29 = vld [vmem:[#allocation11 + $0x10] sm:$0xff] }
 0x1dd   :  { %v456_v31 = vpop.xlane.xlu0 %455 }
 0x1de   :  { %v492_v36 = vrot.slane %v456_v31, %v491_v32 }
 0x1e0   :  { %v462_v33 = vpop.xlane.xlu1 %461 }
 0x1e1   :  { %v459_v35 = vpop.xlane.xlu0 %458  ;;  %v500_v38 = vrot.slane %v462_v33, %v491_v32 }
 0x1e2   :  { %v496_v37 = vrot.slane %v459_v35, %v491_v32 }
 0x1e4   :  { %v522_v39 = vsel %vm521_vm4, %v496_v37, %v492_v36  ;;  %v465_v40 = vpop.xlane.xlu1 %464 }
 0x1e5   :  { %v524_v41 = vsel %vm523_vm5, %v500_v38, %v522_v39  ;;  %v504_v42 = vrot.slane %v465_v40, %v491_v32  ;;  %v468_v43 = vpop.xlane.xlu0 %467  ;;  %v558_v40 = vld [vmem:[#allocation5] sm:$0xff] }
 0x1e6   :  { %v508_v23 = vrot.slane %v468_v43, %v491_v32 }
 0x1e7   :  { %v526_v44 = vsel %vm525_vm6, %v504_v42, %v524_v41 }
 0x1e8   :  { %v528_v45 = vsel %vm527_vm7, %v508_v23, %v526_v44  ;;  %v471_v46 = vpop.xlane.xlu1 %470 }
 0x1e9   :  { %v512_v47 = vrot.slane %v471_v46, %v491_v32  ;;  %v474_v48 = vpop.xlane.xlu0 %473 }
 0x1ea   :  { %v516_v49 = vrot.slane %v474_v48, %v491_v32 }
 0x1eb   :  { %v530_v51 = vsel %vm529_vm8, %v512_v47, %v528_v45 }
 0x1ec   :  { %v532_v52 = vsel %vm531_vm9, %v516_v49, %v530_v51  ;;  %v477_v53 = vpop.xlane.xlu1 %476 }
 0x1ed   :  { %v520_v54 = vrot.slane %v477_v53, %v491_v32  ;;  %v117_v32 = vld [vmem:[#allocation11 + $0x20] sm:$0xff] }
 0x1ef   :  { %v534_v55 = vsel %vm533_vm10, %v520_v54, %v532_v52  ;;  %v113_v52 = vld [vmem:[#allocation11] sm:$0xff] }
 0x1f0   :  { %v536_v56 = vsel %vm478_vm11, %v534_v55, -inf }
 0x1f1   :  { %v542_v57 = vsel %vm539_vm12, %v536_v56, -inf  ;;  %540 = vst.msk [vmem:[#allocation2] sm:$0xff] %vm539_vm12, %v536_v56 }
 0x1f2   :  { %543 = vmax.xlane.f32.xlu0 %v542_v57 }
 0x27f   :  { %v544_v60 = vpop.xlane.xlu0 %543 }
 0x280   :  { %v545_v61 = vmax.f32 %v541_v59, %v544_v60  ;;  %v118_v60 = vld [vmem:[#allocation11 + $0x28] sm:$0xff] }
 0x282   :  { %v546_v62 = vmax.f32 %v545_v61, -3.4028235e+38 }
 0x284   :  { %v547_v63 = vsub.f32 %v541_v59, %v546_v62  ;;  %711 = vst.msk [vmem:[#allocation4] sm:$0xff] %vm100_vm0, %v546_v62  ;;  %552 = vperm.xlu1 %847, %v546_v62  }
 0x286   :  { %v548_v15 = vmul.f32 1.442695, %v547_v63 }
 0x28b   :  { %v719_v16 = vld [vmem:[#allocation4] sm:$0xff] }
 0x303   :  { %v553_v0 = vpop.permute.xlu1 %552 }
 0x304   :  { %v555_v1 = vsub.f32 %v536_v56, %v553_v0 }
 0x306   :  { %v556_v2 = vmul.f32 1.442695, %v555_v1 }
 0x308   :  { %865 = vpow2.f32 %v556_v2 }
 0x309   :  { %867 = vpow2.f32 %v548_v15 }
 0x312   :  { %v866_v4 = vpop.eup %865 }
 0x313   :  { %v560_v5 = vsel %vm539_vm12, %v866_v4, 0.0  ;;  %v583_v6 = vrot.slane %v866_v4, %v582_v3  ;;  %v590_v8 = vrot.slane %v866_v4, %v589_v7  ;;  %v597_v10 = vrot.slane %v866_v4, %v596_v9  ;;  %v868_v22 = vpop.eup %867  ;;  %v120_v7 = vld [vmem:[#allocation11 + $0x38] sm:$0xff] }
 0x314   :  { %561 = vadd.xlane.f32.xlu0 %v560_v5  ;;  %v604_v12 = vrot.slane %v866_v4, %v603_v11  ;;  %v618_v14 = vrot.slane %v866_v4, %v617_v13  ;;  %v576_v17 = vrot.slane %v866_v4, %v1186_v34  ;;  %v611_v19 = vrot.slane %v866_v4, %v610_v18  ;;  %v116_v34 = vld [vmem:[#allocation11 + $0x18] sm:$0xff] }
 0x315   :  { %585 = vbcast.lane.b32.xlu1 %v583_v6, 256  ;;  %v625_v21 = vrot.slane %v866_v4, %v624_v20  ;;  %v559_v45 = vmul.f32 %v868_v22, %v558_v40 }
 0x319   :  { %592 = vbcast.lane.b32.xlu1 %v590_v8, 256 }
 0x31d   :  { %599 = vbcast.lane.b32.xlu1 %v597_v10, 256 }
 0x321   :  { %606 = vbcast.lane.b32.xlu1 %v604_v12, 256 }
 0x325   :  { %620 = vbcast.lane.b32.xlu1 %v618_v14, 256 }
 0x329   :  { %731 = vperm.xlu1 %847, %v719_v16  }
 0x32a   :  { %578 = vbcast.lane.b32.xlu0 %v576_v17, 256 }
 0x32e   :  { %613 = vbcast.lane.b32.xlu0 %v611_v19, 256 }
 0x332   :  { %627 = vbcast.lane.b32.xlu0 %v625_v21, 256 }
 0x336   :  { %569 = vperm.xlu0 %848, %v868_v22  }
 0x387   :  { %v586_v24 = vpop.permute.xlu1 %585 }
 0x388   :  { %v630_v31 = vmul.f32 %v586_v24, %v114_v28 }
 0x38a   :  { %v644_v37 = vsel %vm103_vm1, %v630_v31, 0.0 }
 0x38b   :  { %v593_v26 = vpop.permute.xlu1 %592  ;;  %v645_v42 = vrot.slane %v644_v37, 4 }
 0x38c   :  { %v631_v33 = vmul.f32 %v593_v26, %v115_v29 }
 0x38d   :  { %v646_v50 = vadd.f32 %v645_v42, %v644_v37 }
 0x38e   :  { %v651_v39 = vsel %vm103_vm1, %v631_v33, 0.0 }
 0x38f   :  { %v600_v27 = vpop.permute.xlu1 %599  ;;  %v652_v44 = vrot.slane %v651_v39, 4  ;;  %v647_v59 = vrot.slane %v646_v50, 2 }
 0x390   :  { %v632_v35 = vmul.f32 %v600_v27, %v116_v34 }
 0x391   :  { %v653_v53 = vadd.f32 %v652_v44, %v651_v39  ;;  %v648_v5 = vadd.f32 %v647_v59, %v646_v50 }
 0x392   :  { %v658_v41 = vsel %vm103_vm1, %v632_v35, 0.0 }
 0x393   :  { %v607_v30 = vpop.permute.xlu1 %606  ;;  %v659_v46 = vrot.slane %v658_v41, 4  ;;  %v654_v61 = vrot.slane %v653_v53, 2  ;;  %v649_v19 = vrot.slane %v648_v5, 1 }
 0x394   :  { %v633_v36 = vmul.f32 %v607_v30, %v117_v32 }
 0x395   :  { %v660_v54 = vadd.f32 %v659_v46, %v658_v41  ;;  %v655_v9 = vadd.f32 %v654_v61, %v653_v53  ;;  %v650_v31 = vadd.f32 %v649_v19, %v648_v5 }
 0x396   :  { %v665_v43 = vsel %vm103_vm1, %v633_v36, 0.0 }
 0x397   :  { %v621_v38 = vpop.permute.xlu1 %620  ;;  %v666_v48 = vrot.slane %v665_v43, 4  ;;  %v661_v63 = vrot.slane %v660_v54, 2  ;;  %v656_v22 = vrot.slane %v655_v9, 1 }
 0x398   :  { %v635_v23 = vmul.f32 %v621_v38, %v119_v25 }
 0x399   :  { %v667_v56 = vadd.f32 %v666_v48, %v665_v43  ;;  %v662_v11 = vadd.f32 %v661_v63, %v660_v54  ;;  %v657_v36 = vadd.f32 %v656_v22, %v655_v9  ;;  %v566_v48 = vld [vmem:[#allocation3] sm:$0xff] }
 0x39a   :  { %v679_v51 = vsel %vm103_vm1, %v635_v23, 0.0 }
 0x39b   :  { %v680_v57 = vrot.slane %v679_v51, 4  ;;  %v668_v2 = vrot.slane %v667_v56, 2  ;;  %v663_v26 = vrot.slane %v662_v11, 1 }
 0x39d   :  { %v681_v3 = vadd.f32 %v680_v57, %v679_v51  ;;  %v669_v16 = vadd.f32 %v668_v2, %v667_v56  ;;  %v664_v37 = vadd.f32 %v663_v26, %v662_v11 }
 0x39f   :  { %v682_v17 = vrot.slane %v681_v3, 2  ;;  %v670_v30 = vrot.slane %v669_v16, 1 }
 0x3a1   :  { %v562_v47 = vpop.xlane.xlu0 %561  ;;  %v683_v34 = vadd.f32 %v682_v17, %v681_v3  ;;  %v671_v40 = vadd.f32 %v670_v30, %v669_v16 }
 0x3a2   :  { %v563_v49 = vadd.f32 %v562_v47, %v559_v45 }
 0x3a3   :  { %v684_v41 = vrot.slane %v683_v34, 1 }
 0x3a4   :  { %565 = vst.msk [vmem:[#allocation5] sm:$0xff] %vm100_vm0, %v563_v49 }
 0x3a5   :  { %v579_v55 = vpop.permute.xlu0 %578  ;;  %v685_v51 = vadd.f32 %v684_v41, %v683_v34 }
 0x3a6   :  { %v629_v58 = vmul.f32 %v579_v55, %v113_v52 }
 0x3a8   :  { %v637_v62 = vsel %vm103_vm1, %v629_v58, 0.0  ;;  %v732_v57 = vpop.permute.xlu1 %731  ;;  %v728_v58 = vld [vmem:[#allocation2] sm:$0xff] }
 0x3a9   :  { %v638_v0 = vrot.slane %v637_v62, 4  ;;  %v614_v1 = vpop.permute.xlu0 %613  ;;  %v734_v59 = vsub.f32 %v728_v58, %v732_v57 }
 0x3aa   :  { %v634_v4 = vmul.f32 %v614_v1, %v118_v60 }
 0x3ab   :  { %v639_v6 = vadd.f32 %v638_v0, %v637_v62  ;;  %v715_v8 = vld [vmem:[#allocation5] sm:$0xff]  ;;  %v735_v60 = vmul.f32 1.442695, %v734_v59 }
 0x3ac   :  { %v672_v10 = vsel %vm103_vm1, %v634_v4, 0.0  ;;  %vm716_vm13 = vcmp.gt.f32.partialorder %v715_v8, 0.0 }
 0x3ad   :  { %v640_v12 = vrot.slane %v639_v6, 2  ;;  %v673_v13 = vrot.slane %v672_v10, 4  ;;  %v628_v14 = vpop.permute.xlu0 %627  ;;  %v717_v15 = vsel %vm716_vm13, %v715_v8, 1.0 }
 0x3ae   :  { %v636_v18 = vmul.f32 %v628_v14, %v120_v7  ;;  %869 = vrcp.f32 %v717_v15 }
 0x3af   :  { %v641_v20 = vadd.f32 %v640_v12, %v639_v6  ;;  %v674_v21 = vadd.f32 %v673_v13, %v672_v10  ;;  %871 = vpow2.f32 %v735_v60 }
 0x3b0   :  { %v686_v24 = vsel %vm103_vm1, %v636_v18, 0.0 }
 0x3b1   :  { %v642_v27 = vrot.slane %v641_v20, 1  ;;  %v675_v28 = vrot.slane %v674_v21, 2  ;;  %v687_v29 = vrot.slane %v686_v24, 4 }
 0x3b3   :  { %v643_v32 = vadd.f32 %v642_v27, %v641_v20  ;;  %v676_v33 = vadd.f32 %v675_v28, %v674_v21  ;;  %v688_v35 = vadd.f32 %v687_v29, %v686_v24 }
 0x3b5   :  { %v701_v25 = vsel %vm521_vm4, %v650_v31, %v643_v32  ;;  %v677_v38 = vrot.slane %v676_v33, 1  ;;  %v689_v39 = vrot.slane %v688_v35, 2  ;;  %v570_v50 = vpop.permute.xlu0 %569 }
 0x3b6   :  { %v702_v42 = vsel %vm523_vm5, %v657_v36, %v701_v25  ;;  %v572_v54 = vmul.f32 %v570_v50, %v566_v48 }
 0x3b7   :  { %v678_v43 = vadd.f32 %v677_v38, %v676_v33  ;;  %v690_v23 = vadd.f32 %v689_v39, %v688_v35  ;;  %v703_v44 = vsel %vm525_vm6, %v664_v37, %v702_v42 }
 0x3b8   :  { %v870_v45 = vpop.eup %869  ;;  %v704_v46 = vsel %vm527_vm7, %v671_v40, %v703_v44 }
 0x3b9   :  { %v691_v47 = vrot.slane %v690_v23, 1  ;;  %v705_v49 = vsel %vm529_vm8, %v678_v43, %v704_v46  ;;  %723 = vperm.xlu1 %847, %v870_v45   ;;  %v872_v61 = vpop.eup %871 }
 0x3ba   :  { %v706_v53 = vsel %vm531_vm9, %v685_v51, %v705_v49 }
 0x3bb   :  { %v692_v52 = vadd.f32 %v691_v47, %v690_v23 }
 0x3bd   :  { %v707_v55 = vsel %vm533_vm10, %v692_v52, %v706_v53 }
 0x3be   :  { %v709_v56 = vadd.f32 %v707_v55, %v572_v54 }
 0x3c0   :  { %710 = vst.msk [vmem:[#allocation3] sm:$0xff] %vm103_vm1, %v709_v56 }
 0x3c7   :  { %v720_v62 = vld [vmem:[#allocation3] sm:$0xff] }
 0x438   :  { %v724_v63 = vpop.permute.xlu1 %723 }
 0x439   :  { %v726_v0 = vmul.f32 %v724_v63, %v720_v62  ;;  %v737_v1 = vmul.f32 %v872_v61, %v724_v63 }
 0x43b   :  { %727 = vst.msk [vmem:[#allocation15] sm:$0xff] %vm103_vm1, %v726_v0 }
 0x43c   :  { %738 = vst.msk [vmem:[#allocation16] sm:$0xff] %vm539_vm12, %v737_v1 }
 0x43d   :  { %994 = shalt.err (!%p991_p2)
}
 0x43e   :  { %s995_s29 = scalar_lea.hbm %s1281_s7, 128 }
 0x43f   :  { %p996_p3 = scmp.ne.s32.totalorder %s1281_s7, %s995_s29  ;;  %p999_p4 = scmp.lt.u32.totalorder %s995_s29, %s1281_s7 }
 0x441   :  { %p1001_p5 = pnand %p999_p4, %p996_p3 }
 0x443   :  { %1004 = shalt.err (!%p1001_p5)
}
 0x444   :  { %748 = dma.vmem_to_hbm [thread:$0]  %s746_s21, 128, %s1281_s7, [#allocation8]  }
 0x445   :  { %s1005_s10 = scalar_lea.vmem %s756_s24, 128  ;;  %p1010_p7 = scmp.lt.s32.totalorder %s756_s24, %s756_s24 }
 0x446   :  { %p1006_p6 = scmp.ne.s32.totalorder %s756_s24, %s1005_s10  ;;  %p1011_p8 = scmp.lt.s32.totalorder %s1005_s10, %s1005_s10 }
 0x448   :  { %p1012_p9 = por %p1011_p8, %p1010_p7 }
 0x44a   :  { %p1013_p10 = pnand %p1012_p9, %p1006_p6 }
 0x44c   :  { %1016 = shalt.err (!%p1013_p10)
}
 0x44d   :  { %s1017_s13 = scalar_lea.hbm %s1282_s8, 128 }
 0x44e   :  { %p1018_p11 = scmp.ne.s32.totalorder %s1282_s8, %s1017_s13  ;;  %p1021_p12 = scmp.lt.u32.totalorder %s1017_s13, %s1282_s8 }
 0x450   :  { %p1023_p13 = pnand %p1021_p12, %p1018_p11 }
 0x452   :  { %1026 = shalt.err (!%p1023_p13)
}
 0x453   :  { %758 = dma.vmem_to_hbm [thread:$0]  %s756_s24, 128, %s1282_s8, [#allocation17]  }
 0x454   :  { %1033 = dma.done.wait [#allocation8], 128  }
 0x455   :  { %1034 = vsyncadd [#allocation8], 4294967168 }
 0x456   :  { %1035 = dma.done.wait [#allocation17], 128  }
 0x457   :  { %1036 = vsyncadd [#allocation17], 4294967168 }
 0x458   :  { %765 = vsyncpa [#allocation7], 1 }
 0x459   :  { %766 = vsyncpa [#allocation10], 1 }
 0x45a   :  { %767 = vsyncpa [#allocation13], 1 }
 0x45b   :  { %768 = vsyncpa [#allocation8], 1 }
 0x45c   :  { %769 = vsyncpa [#allocation17], 1 }

</bundles_post_ra>
